<compile_context>
chip_gen: v7x
topology: tpu7x:2x2x1
jax: 0.10.0
libtpu: 0.0.40
codegen_flags: <defaults>
</compile_context>

<pallas_src>
import functools

import jax
import jax.numpy as jnp
from jax.experimental import pallas as pl
from jax.experimental.pallas import tpu as pltpu


def _mlp_kernel(x_ref, w1_ref, b1_ref, w2_ref, b2_ref, o_ref, *, chunk):
    # x_ref:  (tm, D)  row-major input tile (no wrapper-side transpose)
    # w1_ref: (D, D)   fc1 weight, PyTorch (out, in) layout
    # b1_ref: (D, 1)   fc1 bias as a column (one per output feature / sublane row)
    # w2_ref: (D, 1)   fc2 weight as a column
    # b2_ref: (1, 1)   fc2 bias, SMEM scalar
    # o_ref:  (1, tm)  lane-dense output row
    tm = x_ref.shape[0]
    nchunks = tm // chunk

    # Hoist the (tiny) resident weights once per grid step.
    w1 = w1_ref[...]
    b1 = b1_ref[...]
    w2 = w2_ref[...]
    b2 = b2_ref[0, 0]

    def process(start, size):
        xc = x_ref[pl.ds(start, size), :]                            # (size, D)
        # Feature-major fc1: (D, D) @ (D, size) on the MXU; the (size, D) -> (D, size)
        # transpose runs on the otherwise-idle XLU and hides under the next tile's DMA.
        h = jnp.dot(w1, xc.T, preferred_element_type=jnp.float32)    # (D, size)
        h = jnp.maximum(h + b1, 0.0)
        # dropout: identity (inference / eval mode)
        # fc2 has N=1: VPU multiply + sublane reduce keeps the MXU free and the output
        # lane-dense.
        y = jnp.sum(h * w2, axis=0, keepdims=True) + b2              # (1, size)
        o_ref[:, pl.ds(start, size)] = y.astype(o_ref.dtype)

    if nchunks <= 1:
        process(0, tm)
    else:
        def body(c, carry):
            process(pl.multiple_of(c * chunk, chunk), chunk)
            return carry

        jax.lax.fori_loop(0, nchunks, body, 0, unroll=True)


def _pick_tile(M):
    # Big enough that each grid step moves >= ~1 MiB of activations (amortizes the
    # ~0.35 us per-step pipeline overhead); shrink only as far as needed so the grid has
    # >= 2 steps and both v7x TensorCores get work.  Falls back to a single full block
    # for tiny M (block dims == full array dims is always layout-legal).
    tm = 8192
    while tm > 1024 and pl.cdiv(M, tm) < 2:
        tm //= 2
    if M <= tm:
        tm = M
    return tm


@functools.partial(jax.jit, static_argnames=("tm",))
def mlp_forward(features, w1, b1, w2, b2, *, tm=None):
    """features: (B, S, D); w1: (D, D) PyTorch (out, in); b1: (D,); w2: (1, D); b2: (1,).

    Returns (B, S, 1).  Inference semantics (dropout = identity)."""
    B, S, D = features.shape
    M = B * S
    x2d = features.reshape(M, D)            # free reshape; no transpose, no pad

    if tm is None:
        tm = _pick_tile(M)
    chunk = tm if (tm <= 1024 or tm % 1024 != 0) else 1024
    grid = (pl.cdiv(M, tm),)

    b1_c = b1.reshape(D, 1)                 # fc1 bias as a column
    w2_c = w2.reshape(D, 1)                 # fc2 weight as a column
    b2_s = b2.reshape(1, 1)                 # SMEM scalar

    itemsize = jnp.dtype(features.dtype).itemsize
    cost = pl.CostEstimate(
        flops=2 * M * D * (D + 1),
        transcendentals=0,
        bytes_accessed=(M * D + M + D * D + 2 * D + 1) * itemsize,
    )

    out = pl.pallas_call(
        functools.partial(_mlp_kernel, chunk=chunk),
        out_shape=jax.ShapeDtypeStruct((1, M), features.dtype),
        grid_spec=pltpu.PrefetchScalarGridSpec(
            num_scalar_prefetch=0,
            grid=grid,
            in_specs=[
                pl.BlockSpec((tm, D), lambda i: (i, 0)),    # x row tile (ragged last block OK)
                pl.BlockSpec((D, D), lambda i: (0, 0)),     # W1 (full, resident)
                pl.BlockSpec((D, 1), lambda i: (0, 0)),     # b1
                pl.BlockSpec((D, 1), lambda i: (0, 0)),     # W2 column
                pl.BlockSpec(memory_space=pltpu.MemorySpace.SMEM),  # b2 scalar
            ],
            out_specs=pl.BlockSpec((1, tm), lambda i: (0, i)),      # lane-dense output row
        ),
        compiler_params=pltpu.CompilerParams(
            dimension_semantics=("parallel",),
            vmem_limit_bytes=32 * 1024 * 1024,
        ),
        cost_estimate=cost,
    )(x2d, w1, b1_c, w2_c, b2_s)

    # (1, M) -> (B, S, 1) is a free reshape; out-of-range lanes were never written to HBM.
    return out.reshape(B, S, 1)


def _reference(features, w1, b1, w2, b2):
    h = jnp.maximum(features @ w1.T + b1, 0.0)
    return h @ w2.T + b2


if __name__ == "__main__":
    B, S, D = 2, 8, 32   # small shapes consistent with the module (D_MODEL=32)
    key = jax.random.PRNGKey(0)
    kx, k1, k2, k3, k4 = jax.random.split(key, 5)

    features = jax.random.normal(kx, (B, S, D), dtype=jnp.float32)

    # Deterministic parameter init mimicking nn.Linear default (U[-1/sqrt(fan_in), +1/sqrt(fan_in)])
    bound1 = 1.0 / jnp.sqrt(jnp.float32(D))
    w1 = jax.random.uniform(k1, (D, D), minval=-bound1, maxval=bound1, dtype=jnp.float32)
    b1 = jax.random.uniform(k2, (D,), minval=-bound1, maxval=bound1, dtype=jnp.float32)
    w2 = jax.random.uniform(k3, (1, D), minval=-bound1, maxval=bound1, dtype=jnp.float32)
    b2 = jax.random.uniform(k4, (1,), minval=-bound1, maxval=bound1, dtype=jnp.float32)

    out = mlp_forward(features, w1, b1, w2, b2)
    out = jax.block_until_ready(out)

    ref = _reference(features, w1, b1, w2, b2)
    assert out.shape == (B, S, 1), out.shape
    assert jnp.allclose(out, ref, atol=1e-5, rtol=1e-5), "mismatch vs reference"

    print("KERNEL_OK")
</pallas_src>

<mosaic_0001>
module attributes {stable_mosaic.version = 11 : i64} {
  func.func @_mlp_kernel(%arg0: i32, %arg1: memref<16x32xf32, #tpu.memory_space<vmem>>, %arg2: memref<32x32xf32, #tpu.memory_space<vmem>>, %arg3: memref<32x1xf32, #tpu.memory_space<vmem>>, %arg4: memref<32x1xf32, #tpu.memory_space<vmem>>, %arg5: memref<1x1xf32, #tpu.memory_space<smem>>, %arg6: memref<1x16xf32, #tpu.memory_space<vmem>>) attributes {dimension_semantics = [#tpu.dimension_semantics<parallel>], iteration_bounds = array<i64: 1>, scalar_prefetch = 0 : i64, scratch_operands = 0 : i64, tpu.core_type = #tpu.core_type<tc>, window_params = [{transform_indices = @transform_0, window_bounds = array<i64: 16, 32>}, {pipeline_mode = #tpu.pipeline_mode<synchronous>, transform_indices = @transform_1, window_bounds = array<i64: 32, 32>}, {pipeline_mode = #tpu.pipeline_mode<synchronous>, transform_indices = @transform_2, window_bounds = array<i64: 32, 1>}, {pipeline_mode = #tpu.pipeline_mode<synchronous>, transform_indices = @transform_3, window_bounds = array<i64: 32, 1>}, {transform_indices = @transform_4, window_bounds = array<i64: 1, 1>}, {transform_indices = @transform_5, window_bounds = array<i64: 1, 16>}]} {
    %c0 = arith.constant 0 : index
    %c0_0 = arith.constant 0 : index
    %0 = vector.load %arg2[%c0, %c0_0] : memref<32x32xf32, #tpu.memory_space<vmem>>, vector<32x32xf32>
    %c0_1 = arith.constant 0 : index
    %c0_2 = arith.constant 0 : index
    %1 = vector.load %arg3[%c0_1, %c0_2] : memref<32x1xf32, #tpu.memory_space<vmem>>, vector<32x1xf32>
    %c0_3 = arith.constant 0 : index
    %c0_4 = arith.constant 0 : index
    %2 = vector.load %arg4[%c0_3, %c0_4] : memref<32x1xf32, #tpu.memory_space<vmem>>, vector<32x1xf32>
    %c0_5 = arith.constant 0 : index
    %c0_6 = arith.constant 0 : index
    %3 = memref.load %arg5[%c0_5, %c0_6] : memref<1x1xf32, #tpu.memory_space<smem>>
    %c0_7 = arith.constant 0 : index
    %c0_8 = arith.constant 0 : index
    %4 = vector.load %arg1[%c0_7, %c0_8] : memref<16x32xf32, #tpu.memory_space<vmem>>, vector<16x32xf32>
    %5 = tpu.transpose %4, [1, 0] : vector<16x32xf32> -> vector<32x16xf32>
    %cst = arith.constant dense<0.000000e+00> : vector<32x16xf32>
    %6 = tpu.matmul %0, %5, %cst {dimension_numbers = #tpu.dot_dimension_numbers<[1], [0], [0], [1], [0, 0, 1, 1], [], []>} : vector<32x32xf32>, vector<32x16xf32>, vector<32x16xf32> -> vector<32x16xf32>
    %7 = vector.broadcast %1 : vector<32x1xf32> to vector<32x16xf32>
    %8 = arith.addf %6, %7 : vector<32x16xf32>
    %cst_9 = arith.constant 0.000000e+00 : f32
    %9 = vector.broadcast %cst_9 : f32 to vector<32x16xf32>
    %10 = arith.maximumf %8, %9 : vector<32x16xf32>
    %11 = vector.broadcast %2 : vector<32x1xf32> to vector<32x16xf32>
    %12 = arith.mulf %10, %11 : vector<32x16xf32>
    %cst_10 = arith.constant dense<0.000000e+00> : vector<16xf32>
    %13 = vector.multi_reduction <add>, %12, %cst_10 [0] : vector<32x16xf32> to vector<16xf32>
    %14 = vector.shape_cast %13 : vector<16xf32> to vector<1x16xf32>
    %15 = vector.broadcast %3 : f32 to vector<1x16xf32>
    %16 = arith.addf %14, %15 : vector<1x16xf32>
    %c0_11 = arith.constant 0 : index
    %c0_12 = arith.constant 0 : index
    %17 = vector.load %arg6[%c0_11, %c0_12] : memref<1x16xf32, #tpu.memory_space<vmem>>, vector<1x16xf32>
    tpu.vector_store %arg6[%c0_11, %c0_12], %16 {strides = array<i32>} : memref<1x16xf32, #tpu.memory_space<vmem>>, vector<1x16xf32>,
    return
  }
  func.func @transform_0(%arg0: i32) -> (i32, i32) {
    %c0_i32 = arith.constant 0 : i32
    %c0_i32_0 = arith.constant 0 : i32
    return %arg0, %c0_i32 : i32, i32
  }
  func.func @transform_1(%arg0: i32) -> (i32, i32) {
    %c0_i32 = arith.constant 0 : i32
    %c0_i32_0 = arith.constant 0 : i32
    %c0_i32_1 = arith.constant 0 : i32
    return %c0_i32, %c0_i32_0 : i32, i32
  }
  func.func @transform_2(%arg0: i32) -> (i32, i32) {
    %c0_i32 = arith.constant 0 : i32
    %c0_i32_0 = arith.constant 0 : i32
    %c0_i32_1 = arith.constant 0 : i32
    return %c0_i32, %c0_i32_0 : i32, i32
  }
  func.func @transform_3(%arg0: i32) -> (i32, i32) {
    %c0_i32 = arith.constant 0 : i32
    %c0_i32_0 = arith.constant 0 : i32
    %c0_i32_1 = arith.constant 0 : i32
    return %c0_i32, %c0_i32_0 : i32, i32
  }
  func.func @transform_4(%arg0: i32) -> (i32, i32) {
    %c0_i32 = arith.constant 0 : i32
    %c0_i32_0 = arith.constant 0 : i32
    %c0_i32_1 = arith.constant 0 : i32
    return %c0_i32, %c0_i32_0 : i32, i32
  }
  func.func @transform_5(%arg0: i32) -> (i32, i32) {
    %c0_i32 = arith.constant 0 : i32
    %c0_i32_0 = arith.constant 0 : i32
    return %c0_i32, %arg0 : i32, i32
  }
}

</mosaic_0001>

<bundles_post_ra>
// kernel: mlp_forward.1
= control target key start
LH: loop header
LB: loop body
LE: loop exit
PB: predicated region body
PF: predicated region fallthrough
CT: control target
= control target key end

     0   :  { %vm56_vm0 = vcmask 261120   ;;  %v243_v2 = vmov 0   ;;  %vm188_vm2 = vcmask 130048   ;;  %vm204_vm3 = vcmask 122880   ;;  %s328_s0 = inlined_call_operand.vmem [shape: f32[16,32], index: 0, kind: input, shape index: {}]   ;;  %s329_s1 = inlined_call_operand.vmem [shape: f32[32,32], index: 1, kind: input, shape index: {}]   ;;  %s330_s2 = inlined_call_operand.vmem [shape: f32[32,1], index: 2, kind: input, shape index: {}]   ;;  %s331_s3 = inlined_call_operand.vmem [shape: f32[32,1], index: 3, kind: input, shape index: {}]   ;;  %s332_s4 = inlined_call_operand.<no memory space> [shape: f32[1,1], index: 4, kind: input, shape index: {}]   ;;  %s333_s5 = inlined_call_operand.vmem [shape: f32[1,16], index: 5, kind: output, shape index: {}]  }
   0x1   :  { %v34_v0 = vld [vmem:[%s328_s0] sm:$0xff]  ;;  %v35_v1 = vld [vmem:[%s328_s0 + $0x8] sm:$0xff]  ;;  %vm233_vm1 = vmpackc.low %vm56_vm0, %vm56_vm0  ;;  %241 = vset.pattern.permute.xlu0 %v243_v2  ;;  %242 = vset.pattern.permute.xlu1 %v243_v2  ;;  %v202_v52 = vstv %s332_s4 }
   0x2   :  { %v232_v3 = vpack.c.bf16 %v35_v1, %v34_v0  ;;  %v21_v4 = vld [vmem:[%s329_s1] sm:$0xff]  ;;  %v23_v5 = vld [vmem:[%s329_s1 + $0x10] sm:$0xff]  ;;  %v26_v8 = vld [vmem:[%s330_s2 + $0x8] sm:$0xff] }
   0x3   :  { %226 = vmatprep.mubr.msk.f32.mxu0 %vm56_vm0, %v21_v4  ;;  %229 = vmatprep.mubr.msk.f32.mxu1 %vm56_vm0, %v23_v5  ;;  %v25_v6 = vld [vmem:[%s330_s2] sm:$0xff]  ;;  %v27_v7 = vld [vmem:[%s330_s2 + $0x10] sm:$0xff]  ;;  %v28_v9 = vld [vmem:[%s330_s2 + $0x18] sm:$0xff] }
   0x4   :  { %234 = vmatprep.subr.msk.bf16.mxu0 %vm233_vm1, %v232_v3  ;;  %238 = vmatprep.subr.msk.bf16.mxu1 %vm233_vm1, %v232_v3  ;;  %v22_v10 = vld [vmem:[%s329_s1 + $0x8] sm:$0xff]  ;;  %v24_v11 = vld [vmem:[%s329_s1 + $0x18] sm:$0xff]  ;;  %v29_v12 = vld [vmem:[%s331_s3] sm:$0xff] }
   0x5   :  { %237 = vmatpush3.bf16.xpose.msk.msra.mxu0 %vm233_vm1, %v232_v3  ;;  %239 = vmatpush3.bf16.xpose.msk.msra.mxu1 %vm233_vm1, %v232_v3  ;;  %v30_v13 = vld [vmem:[%s331_s3 + $0x8] sm:$0xff]  ;;  %v31_v14 = vld [vmem:[%s331_s3 + $0x10] sm:$0xff]  ;;  %v32_v15 = vld [vmem:[%s331_s3 + $0x18] sm:$0xff] }
   0x6   :  { %38 = vperm.xlu0 %241, %v25_v6   ;;  %48 = vperm.xlu1 %242, %v27_v7  }
   0xa   :  { %43 = vperm.xlu0 %241, %v26_v8   ;;  %53 = vperm.xlu1 %242, %v28_v9  }
   0xc   :  { %227 = vmatmul.mubr.msk.f32.vlgmr.msra.gmra.mrb[0].mxu0 %vm56_vm0, %v22_v10  ;;  %230 = vmatmul.mubr.msk.f32.vlgmr.msra.gmra.mrb[0].mxu1 %vm56_vm0, %v24_v11 }
   0xe   :  { %166 = vperm.xlu0 %241, %v29_v12   ;;  %171 = vperm.xlu1 %242, %v30_v13  }
  0x12   :  { %176 = vperm.xlu0 %241, %v31_v14   ;;  %181 = vperm.xlu1 %242, %v32_v15  }
  0x85   :  { %v39_v16 = vpop.permute.xlu0 %38  ;;  %v49_v17 = vpop.permute.xlu1 %48 }
  0x89   :  { %v44_v18 = vpop.permute.xlu0 %43  ;;  %v54_v19 = vpop.permute.xlu1 %53 }
  0x8d   :  { %v167_v20 = vpop.permute.xlu0 %166  ;;  %v172_v21 = vpop.permute.xlu1 %171 }
  0x91   :  { %v177_v34 = vpop.permute.xlu0 %176  ;;  %v182_v38 = vpop.permute.xlu1 %181 }
  0xdf   :  { %v228_v22 = vpop.f32.mrb[0].mxu0  ;;  %v231_v23 = vpop.f32.mrb[0].mxu1 }
  0xe0   :  { %v147_v24 = vadd.f32 %v228_v22, %v44_v18  ;;  %v157_v25 = vadd.f32 %v231_v23, %v54_v19  ;;  %v141_v26 = vpop.f32.mrb[1].mxu0  ;;  %v151_v27 = vpop.f32.mrb[1].mxu1 }
  0xe1   :  { %v142_v28 = vadd.f32 %v141_v26, %v39_v16  ;;  %v152_v29 = vadd.f32 %v151_v27, %v49_v17 }
  0xe2   :  { %v161_v30 = vmax.f32 %v147_v24, 0.0  ;;  %v163_v31 = vmax.f32 %v157_v25, 0.0 }
  0xe3   :  { %v160_v32 = vmax.f32 %v142_v28, 0.0  ;;  %v162_v33 = vmax.f32 %v152_v29, 0.0 }
  0xe4   :  { %v185_v35 = vmul.f32 %v172_v21, %v161_v30  ;;  %v187_v40 = vmul.f32 %v182_v38, %v163_v31 }
  0xe5   :  { %v184_v36 = vmul.f32 %v167_v20, %v160_v32  ;;  %v186_v37 = vmul.f32 %v177_v34, %v162_v33 }
  0xe6   :  { %v190_v39 = vsel %vm188_vm2, %v185_v35, 0.0  ;;  %v194_v45 = vsel %vm188_vm2, %v187_v40, 0.0 }
  0xe7   :  { %v189_v41 = vsel %vm188_vm2, %v184_v36, 0.0  ;;  %v192_v43 = vsel %vm188_vm2, %v186_v37, 0.0 }
  0xe8   :  { %v191_v42 = vadd.f32 %v190_v39, %v189_v41 }
  0xea   :  { %v193_v44 = vadd.f32 %v192_v43, %v191_v42 }
  0xec   :  { %v195_v46 = vadd.f32 %v194_v45, %v193_v44 }
  0xee   :  { %v196_v47 = vrot.slane %v195_v46, 4 }
  0xf0   :  { %v197_v48 = vadd.f32 %v196_v47, %v195_v46 }
  0xf2   :  { %v198_v49 = vrot.slane %v197_v48, 2 }
  0xf4   :  { %v199_v50 = vadd.f32 %v198_v49, %v197_v48 }
  0xf6   :  { %v200_v51 = vrot.slane %v199_v50, 1 }
  0xf8   :  { %v201_v53 = vadd.f32 %v200_v51, %v199_v50 }
  0xfa   :  { %v203_v54 = vadd.f32 %v202_v52, %v201_v53 }
  0xfc   :  { %205 = vst.msk [vmem:[%s333_s5] sm:$0x1] %vm204_vm3, %v203_v54 }

</bundles_post_ra>
